<compile_context>
chip_gen: v6e
topology: v6e:2x2x1
jax: 0.10.0
libtpu: 0.0.40
codegen_flags: <defaults>
</compile_context>

<pallas_src>
import functools
import math

import jax
import jax.numpy as jnp
from jax.experimental import pallas as pl
from jax.experimental.pallas import tpu as pltpu


def encoder_layer_kernel(x_ref, vis_ref, wqkv_ref, wo_ref, vec_ref, out_ref, *,
                         nhead, d_k, d_v, nhid, gamma, residual, eps, tb, seq):
    n = seq
    m = tb * n
    d_qk = nhead * d_k
    d_vt = nhead * d_v
    out_lanes = out_ref.shape[-1]

    # ---- load activation block & resident params -----------------------------------
    x = x_ref[...].reshape(m, nhid)                     # [m, nhid] f32 (residual path)
    x_bf = x.astype(jnp.bfloat16)                       # MXU operand

    w_qkv = wqkv_ref[...]                               # [nhid, 2*d_qk + d_vt]  bf16
    wo = wo_ref[...]                                    # [d_vt, nhid]           bf16
    b_qkv = vec_ref[0:1, :2 * d_qk + d_vt]              # [1, 2*d_qk+d_vt] f32
    bo = vec_ref[1:2, :nhid]                            # [1, nhid]
    ln_g = vec_ref[2:3, :nhid]
    ln_b = vec_ref[3:4, :nhid]
    alpha = vec_ref[4:5, :nhid]                         # PReLU scalar, broadcast row

    vis_mix = vis_ref[...] * (1.0 - gamma)              # [n, n] f32, hoisted

    # ---- fused QKV projection: ONE bf16 MXU pass over all TB sequences -------------
    qkv = jnp.dot(x_bf, w_qkv, preferred_element_type=jnp.float32) + b_qkv   # [m, 96]
    q = qkv[:, :d_qk]                                   # already scaled by 1/sqrt(d_k)
    k = qkv[:, d_qk:2 * d_qk]
    v = qkv[:, 2 * d_qk:2 * d_qk + d_vt]

    # ---- head-batched attention: 2 rank-3 einsums instead of 3*nhead tiny dots -----
    def heads(t, d):
        # [m, nhead*d] -> [nhead*tb, n, d]; static row/lane slices, batch index g = h*tb + b.
        parts = [t[b * n:(b + 1) * n, h * d:(h + 1) * d]
                 for h in range(nhead) for b in range(tb)]
        return jnp.stack(parts, axis=0).astype(jnp.bfloat16)

    q_h = heads(q, d_k)                                 # [g, n, d_k] bf16
    k_h = heads(k, d_k)                                 # [g, n, d_k] bf16
    v_h = heads(v, d_v)                                 # [g, n, d_v] bf16

    scores = jnp.einsum('gnd,gmd->gnm', q_h, k_h,
                        preferred_element_type=jnp.float32)                  # [g, n, n]
    scores = scores - jnp.max(scores, axis=-1, keepdims=True)
    e = jnp.exp(scores)
    attn = e * pl.reciprocal(jnp.sum(e, axis=-1, keepdims=True), approx=True)

    # NOTE: the reference ScaledDotProductAttention never applies attn_mask; it only
    # blends attn with visible_M. This is intentional, not a bug.
    mixed = (attn * gamma + vis_mix[None, :, :]).astype(jnp.bfloat16)
    ctx = jnp.einsum('gnm,gmd->gnd', mixed, v_h,
                     preferred_element_type=jnp.float32)                     # [g, n, d_v]

    # ---- re-pack heads onto lanes, then ONE output projection -----------------------
    ctx_cols = []
    for h in range(nhead):
        rows = jnp.concatenate([ctx[h * tb + b] for b in range(tb)], axis=0)  # [m, d_v]
        ctx_cols.append(rows)
    ctx_all = jnp.concatenate(ctx_cols, axis=-1).astype(jnp.bfloat16)         # [m, d_vt]

    out = jnp.dot(ctx_all, wo, preferred_element_type=jnp.float32) + bo       # [m, nhid]
    if residual:
        out = out + x                                   # residual = V = enc_inputs

    # ---- LayerNorm (f32, PyTorch default eps, biased variance) + PReLU --------------
    mean = jnp.mean(out, axis=-1, keepdims=True)
    var = jnp.mean((out - mean) ** 2, axis=-1, keepdims=True)
    out = (out - mean) * jax.lax.rsqrt(var + eps) * ln_g + ln_b
    out = jnp.where(out > 0.0, out, alpha * out)

    # TODO(synk): nn.Dropout is identity in eval mode; no stochastic masking implemented.

    # ---- lane-dense store: pad hidden to a multiple of 128 lanes (unmasked vst) -----
    if out_lanes != nhid:
        out = jnp.concatenate(
            [out, jnp.zeros((m, out_lanes - nhid), jnp.float32)], axis=-1)
    out_ref[...] = out.reshape(tb, n, out_lanes)


def pack_params(params, *, nhead, d_k, d_v, nhid):
    """One-time parameter packing (construction time, not per-call math)."""
    d_qk = nhead * d_k
    d_vt = nhead * d_v
    inv_sqrt_dk = jnp.float32(1.0 / math.sqrt(d_k))
    wq = params["wq"] * inv_sqrt_dk                     # fold 1/sqrt(d_k) into Wq / bq
    bq = params["bq"] * inv_sqrt_dk

    # bf16 MXU weight slabs (f32 accumulation happens in-kernel).
    wqkv_slab = jnp.concatenate([wq, params["wk"], params["wv"]],
                                axis=1).astype(jnp.bfloat16)       # [nhid, 2*d_qk+d_vt]
    wo_slab = params["wo"].astype(jnp.bfloat16)                     # [d_vt, nhid]

    # All 1-row vectors grouped into one tile-aligned (8, 128k) f32 slab.
    width = ((max(2 * d_qk + d_vt, nhid) + 127) // 128) * 128
    b_qkv = jnp.concatenate([bq, params["bk"], params["bv"]], axis=1)
    vec = jnp.zeros((8, width), jnp.float32)
    vec = vec.at[0, :2 * d_qk + d_vt].set(b_qkv[0])
    vec = vec.at[1, :nhid].set(params["bo"][0])
    vec = vec.at[2, :nhid].set(params["ln_g"][0])
    vec = vec.at[3, :nhid].set(params["ln_b"][0])
    vec = vec.at[4, :nhid].set(jnp.broadcast_to(params["alpha"].reshape(()), (nhid,)))
    return wqkv_slab, wo_slab, vec


def _pick_tb(batch, seq, *, max_rows=512, min_steps=1):
    """Largest batch tile (divisor of batch) with tb*seq <= max_rows and >= min_steps
    grid steps. On v7x (2 TensorCores) prefer min_steps=2 when batch allows it."""
    tb = 1
    for cand in range(1, batch + 1):
        if batch % cand == 0 and cand * seq <= max_rows and batch // cand >= min_steps:
            tb = cand
    return tb


def encoder_layer(x, attn_mask, visible_M, packed, *, nhead, d_k, d_v,
                  gamma, residual=True, batch_tile=None):
    # attn_mask is accepted for interface parity but is unused, exactly like the
    # reference ScaledDotProductAttention.
    del attn_mask
    B, N, nhid = x.shape
    wqkv_slab, wo_slab, vec_slab = packed

    tb = batch_tile if batch_tile is not None else _pick_tb(B, N)
    assert B % tb == 0
    steps = B // tb
    out_lanes = ((nhid + 127) // 128) * 128             # lane-dense output block

    kern = functools.partial(encoder_layer_kernel, nhead=nhead, d_k=d_k, d_v=d_v,
                             nhid=nhid, gamma=gamma, residual=residual, eps=1e-5,
                             tb=tb, seq=N)

    grid_spec = pltpu.PrefetchScalarGridSpec(
        num_scalar_prefetch=0,
        grid=(steps,),
        in_specs=[
            # Per-step activation block covering TB whole sequences (pipelined).
            pl.BlockSpec((tb, N, nhid), lambda b: (b, 0, 0)),
            # Shared visible_M and the three param slabs stay resident (constant idx).
            pl.BlockSpec(visible_M.shape, lambda b: (0, 0)),
            pl.BlockSpec(wqkv_slab.shape, lambda b: (0, 0)),
            pl.BlockSpec(wo_slab.shape, lambda b: (0, 0)),
            pl.BlockSpec(vec_slab.shape, lambda b: (0, 0)),
        ],
        out_specs=pl.BlockSpec((tb, N, out_lanes), lambda b: (b, 0, 0)),
    )

    out = pl.pallas_call(
        kern,
        out_shape=jax.ShapeDtypeStruct((B, N, out_lanes), jnp.float32),
        grid_spec=grid_spec,
        compiler_params=pltpu.CompilerParams(dimension_semantics=("parallel",)),
    )(x, visible_M, wqkv_slab, wo_slab, vec_slab)
    return out[..., :nhid] if out_lanes != nhid else out


def encoder_layer_ref(x, visible_M, params, *, nhead, d_k, d_v, gamma, residual=True):
    """Pure-JAX f32 reference (mirrors the PyTorch module), for correctness checking."""
    hi = jax.lax.Precision.HIGHEST
    q = jnp.dot(x, params["wq"], precision=hi) + params["bq"]
    k = jnp.dot(x, params["wk"], precision=hi) + params["bk"]
    v = jnp.dot(x, params["wv"], precision=hi) + params["bv"]
    N = x.shape[0]
    qh = q.reshape(N, nhead, d_k).transpose(1, 0, 2)
    kh = k.reshape(N, nhead, d_k).transpose(1, 0, 2)
    vh = v.reshape(N, nhead, d_v).transpose(1, 0, 2)
    scores = jnp.einsum("hnd,hmd->hnm", qh, kh, precision=hi) / math.sqrt(d_k)
    attn = jax.nn.softmax(scores, axis=-1)
    mixed = attn * gamma + visible_M[None] * (1.0 - gamma)
    ctx = jnp.einsum("hnm,hmd->hnd", mixed, vh, precision=hi)
    ctx = ctx.transpose(1, 0, 2).reshape(N, nhead * d_v)
    out = jnp.dot(ctx, params["wo"], precision=hi) + params["bo"]
    if residual:
        out = out + x
    mean = jnp.mean(out, axis=-1, keepdims=True)
    var = jnp.mean((out - mean) ** 2, axis=-1, keepdims=True)
    out = (out - mean) * jax.lax.rsqrt(var + 1e-5) * params["ln_g"] + params["ln_b"]
    out = jnp.where(out > 0.0, out, params["alpha"][0] * out)
    return out


if __name__ == "__main__":
    # Small shapes implied by the forward: seq N=8, nhid=32, nhead=4, d_k=d_v=8; batch B=2.
    B, N, nhid, nhead, d_k, d_v = 2, 8, 32, 4, 8, 8
    gamma = 0.5

    key = jax.random.PRNGKey(0)
    ks = jax.random.split(key, 10)

    x = jax.random.normal(ks[0], (B, N, nhid), jnp.float32)
    attn_mask = jnp.zeros((N, N), jnp.float32)                      # unused by the module
    visible_M = jax.nn.softmax(jax.random.normal(ks[1], (N, N), jnp.float32), axis=-1)

    params = dict(
        wq=0.1 * jax.random.normal(ks[2], (nhid, nhead * d_k), jnp.float32),
        bq=0.01 * jax.random.normal(ks[3], (1, nhead * d_k), jnp.float32),
        wk=0.1 * jax.random.normal(ks[4], (nhid, nhead * d_k), jnp.float32),
        bk=0.01 * jax.random.normal(ks[5], (1, nhead * d_k), jnp.float32),
        wv=0.1 * jax.random.normal(ks[6], (nhid, nhead * d_v), jnp.float32),
        bv=0.01 * jax.random.normal(ks[7], (1, nhead * d_v), jnp.float32),
        wo=0.1 * jax.random.normal(ks[8], (nhead * d_v, nhid), jnp.float32),
        bo=0.01 * jax.random.normal(ks[9], (1, nhid), jnp.float32),
        ln_g=jnp.ones((1, nhid), jnp.float32),
        ln_b=jnp.zeros((1, nhid), jnp.float32),
        alpha=jnp.full((1,), 0.25, jnp.float32),                    # PReLU default
    )

    packed = pack_params(params, nhead=nhead, d_k=d_k, d_v=d_v, nhid=nhid)

    out = encoder_layer(x, attn_mask, visible_M, packed,
                        nhead=nhead, d_k=d_k, d_v=d_v, gamma=gamma, residual=True)
    jax.block_until_ready(out)
    assert out.shape == (B, N, nhid) and out.dtype == jnp.float32

    # Correctness check against a pure-JAX f32 reference (per-sequence, like the PyTorch
    # module). Tolerance loosened vs. the previous all-f32 kernel because the MXU
    # operands are now bf16 (per perf review).
    ref = jnp.stack([
        encoder_layer_ref(x[b], visible_M, params, nhead=nhead, d_k=d_k, d_v=d_v,
                          gamma=gamma, residual=True)
        for b in range(B)
    ])
    assert jnp.allclose(out, ref, atol=3e-2, rtol=3e-2), \
        f"max abs diff {jnp.max(jnp.abs(out - ref))}"

    print("KERNEL_OK")
</pallas_src>

<mosaic_0001>
module attributes {stable_mosaic.version = 11 : i64} {
  func.func @encoder_layer_kernel(%arg0: i32, %arg1: memref<2x8x32xf32, #tpu.memory_space<vmem>>, %arg2: memref<8x8xf32, #tpu.memory_space<vmem>>, %arg3: memref<32x96xbf16, #tpu.memory_space<vmem>>, %arg4: memref<32x32xbf16, #tpu.memory_space<vmem>>, %arg5: memref<8x128xf32, #tpu.memory_space<vmem>>, %arg6: memref<2x8x128xf32, #tpu.memory_space<vmem>>) attributes {dimension_semantics = [#tpu.dimension_semantics<parallel>], iteration_bounds = array<i64: 1>, scalar_prefetch = 0 : i64, scratch_operands = 0 : i64, tpu.core_type = #tpu.core_type<tc>, window_params = [{transform_indices = @transform_0, window_bounds = array<i64: 2, 8, 32>}, {pipeline_mode = #tpu.pipeline_mode<synchronous>, transform_indices = @transform_1, window_bounds = array<i64: 8, 8>}, {pipeline_mode = #tpu.pipeline_mode<synchronous>, transform_indices = @transform_2, window_bounds = array<i64: 32, 96>}, {pipeline_mode = #tpu.pipeline_mode<synchronous>, transform_indices = @transform_3, window_bounds = array<i64: 32, 32>}, {pipeline_mode = #tpu.pipeline_mode<synchronous>, transform_indices = @transform_4, window_bounds = array<i64: 8, 128>}, {transform_indices = @transform_5, window_bounds = array<i64: 2, 8, 128>}]} {
    %c0 = arith.constant 0 : index
    %c0_0 = arith.constant 0 : index
    %c0_1 = arith.constant 0 : index
    %0 = vector.load %arg1[%c0, %c0_0, %c0_1] : memref<2x8x32xf32, #tpu.memory_space<vmem>>, vector<2x8x32xf32>
    %1 = vector.shape_cast %0 : vector<2x8x32xf32> to vector<16x32xf32>
    %2 = arith.truncf %1 : vector<16x32xf32> to vector<16x32xbf16>
    %c0_2 = arith.constant 0 : index
    %c0_3 = arith.constant 0 : index
    %3 = vector.load %arg3[%c0_2, %c0_3] : memref<32x96xbf16, #tpu.memory_space<vmem>>, vector<32x96xbf16>
    %c0_4 = arith.constant 0 : index
    %c0_5 = arith.constant 0 : index
    %4 = vector.load %arg4[%c0_4, %c0_5] : memref<32x32xbf16, #tpu.memory_space<vmem>>, vector<32x32xbf16>
    %c0_6 = arith.constant 0 : index
    %c0_7 = arith.constant 0 : index
    %5 = vector.load %arg5[%c0_6, %c0_7] : memref<8x128xf32, #tpu.memory_space<vmem>>, vector<1x96xf32>
    %c1 = arith.constant 1 : index
    %c0_8 = arith.constant 0 : index
    %6 = vector.load %arg5[%c1, %c0_8] : memref<8x128xf32, #tpu.memory_space<vmem>>, vector<1x32xf32>
    %c2 = arith.constant 2 : index
    %c0_9 = arith.constant 0 : index
    %7 = vector.load %arg5[%c2, %c0_9] : memref<8x128xf32, #tpu.memory_space<vmem>>, vector<1x32xf32>
    %c3 = arith.constant 3 : index
    %c0_10 = arith.constant 0 : index
    %8 = vector.load %arg5[%c3, %c0_10] : memref<8x128xf32, #tpu.memory_space<vmem>>, vector<1x32xf32>
    %c4 = arith.constant 4 : index
    %c0_11 = arith.constant 0 : index
    %9 = vector.load %arg5[%c4, %c0_11] : memref<8x128xf32, #tpu.memory_space<vmem>>, vector<1x32xf32>
    %c0_12 = arith.constant 0 : index
    %c0_13 = arith.constant 0 : index
    %10 = vector.load %arg2[%c0_12, %c0_13] : memref<8x8xf32, #tpu.memory_space<vmem>>, vector<8x8xf32>
    %cst = arith.constant 5.000000e-01 : f32
    %11 = vector.broadcast %cst : f32 to vector<8x8xf32>
    %12 = arith.mulf %10, %11 : vector<8x8xf32>
    %cst_14 = arith.constant dense<0.000000e+00> : vector<16x96xf32>
    %13 = tpu.matmul %2, %3, %cst_14 {dimension_numbers = #tpu.dot_dimension_numbers<[1], [0], [0], [1], [0, 0, 1, 1], [], []>} : vector<16x32xbf16>, vector<32x96xbf16>, vector<16x96xf32> -> vector<16x96xf32>
    %14 = vector.broadcast %5 : vector<1x96xf32> to vector<16x96xf32>
    %15 = arith.addf %13, %14 : vector<16x96xf32>
    %16 = vector.extract_strided_slice %15 {offsets = [0, 0], sizes = [16, 32], strides = [1, 1]} : vector<16x96xf32> to vector<16x32xf32>
    %17 = vector.extract_strided_slice %15 {offsets = [0, 32], sizes = [16, 32], strides = [1, 1]} : vector<16x96xf32> to vector<16x32xf32>
    %18 = vector.extract_strided_slice %15 {offsets = [0, 64], sizes = [16, 32], strides = [1, 1]} : vector<16x96xf32> to vector<16x32xf32>
    %19 = vector.extract_strided_slice %16 {offsets = [0, 0], sizes = [8, 8], strides = [1, 1]} : vector<16x32xf32> to vector<8x8xf32>
    %20 = vector.extract_strided_slice %16 {offsets = [8, 0], sizes = [8, 8], strides = [1, 1]} : vector<16x32xf32> to vector<8x8xf32>
    %21 = vector.extract_strided_slice %16 {offsets = [0, 8], sizes = [8, 8], strides = [1, 1]} : vector<16x32xf32> to vector<8x8xf32>
    %22 = vector.extract_strided_slice %16 {offsets = [8, 8], sizes = [8, 8], strides = [1, 1]} : vector<16x32xf32> to vector<8x8xf32>
    %23 = vector.extract_strided_slice %16 {offsets = [0, 16], sizes = [8, 8], strides = [1, 1]} : vector<16x32xf32> to vector<8x8xf32>
    %24 = vector.extract_strided_slice %16 {offsets = [8, 16], sizes = [8, 8], strides = [1, 1]} : vector<16x32xf32> to vector<8x8xf32>
    %25 = vector.extract_strided_slice %16 {offsets = [0, 24], sizes = [8, 8], strides = [1, 1]} : vector<16x32xf32> to vector<8x8xf32>
    %26 = vector.extract_strided_slice %16 {offsets = [8, 24], sizes = [8, 8], strides = [1, 1]} : vector<16x32xf32> to vector<8x8xf32>
    %27 = vector.shape_cast %19 : vector<8x8xf32> to vector<1x8x8xf32>
    %28 = vector.shape_cast %20 : vector<8x8xf32> to vector<1x8x8xf32>
    %29 = vector.shape_cast %21 : vector<8x8xf32> to vector<1x8x8xf32>
    %30 = vector.shape_cast %22 : vector<8x8xf32> to vector<1x8x8xf32>
    %31 = vector.shape_cast %23 : vector<8x8xf32> to vector<1x8x8xf32>
    %32 = vector.shape_cast %24 : vector<8x8xf32> to vector<1x8x8xf32>
    %33 = vector.shape_cast %25 : vector<8x8xf32> to vector<1x8x8xf32>
    %34 = vector.shape_cast %26 : vector<8x8xf32> to vector<1x8x8xf32>
    %35 = tpu.concatenate %27, %28, %29, %30, %31, %32, %33, %34 in 0 : vector<1x8x8xf32>, vector<1x8x8xf32>, vector<1x8x8xf32>, vector<1x8x8xf32>, vector<1x8x8xf32>, vector<1x8x8xf32>, vector<1x8x8xf32>, vector<1x8x8xf32> -> vector<8x8x8xf32>
    %36 = arith.truncf %35 : vector<8x8x8xf32> to vector<8x8x8xbf16>
    %37 = vector.extract_strided_slice %17 {offsets = [0, 0], sizes = [8, 8], strides = [1, 1]} : vector<16x32xf32> to vector<8x8xf32>
    %38 = vector.extract_strided_slice %17 {offsets = [8, 0], sizes = [8, 8], strides = [1, 1]} : vector<16x32xf32> to vector<8x8xf32>
    %39 = vector.extract_strided_slice %17 {offsets = [0, 8], sizes = [8, 8], strides = [1, 1]} : vector<16x32xf32> to vector<8x8xf32>
    %40 = vector.extract_strided_slice %17 {offsets = [8, 8], sizes = [8, 8], strides = [1, 1]} : vector<16x32xf32> to vector<8x8xf32>
    %41 = vector.extract_strided_slice %17 {offsets = [0, 16], sizes = [8, 8], strides = [1, 1]} : vector<16x32xf32> to vector<8x8xf32>
    %42 = vector.extract_strided_slice %17 {offsets = [8, 16], sizes = [8, 8], strides = [1, 1]} : vector<16x32xf32> to vector<8x8xf32>
    %43 = vector.extract_strided_slice %17 {offsets = [0, 24], sizes = [8, 8], strides = [1, 1]} : vector<16x32xf32> to vector<8x8xf32>
    %44 = vector.extract_strided_slice %17 {offsets = [8, 24], sizes = [8, 8], strides = [1, 1]} : vector<16x32xf32> to vector<8x8xf32>
    %45 = vector.shape_cast %37 : vector<8x8xf32> to vector<1x8x8xf32>
    %46 = vector.shape_cast %38 : vector<8x8xf32> to vector<1x8x8xf32>
    %47 = vector.shape_cast %39 : vector<8x8xf32> to vector<1x8x8xf32>
    %48 = vector.shape_cast %40 : vector<8x8xf32> to vector<1x8x8xf32>
    %49 = vector.shape_cast %41 : vector<8x8xf32> to vector<1x8x8xf32>
    %50 = vector.shape_cast %42 : vector<8x8xf32> to vector<1x8x8xf32>
    %51 = vector.shape_cast %43 : vector<8x8xf32> to vector<1x8x8xf32>
    %52 = vector.shape_cast %44 : vector<8x8xf32> to vector<1x8x8xf32>
    %53 = tpu.concatenate %45, %46, %47, %48, %49, %50, %51, %52 in 0 : vector<1x8x8xf32>, vector<1x8x8xf32>, vector<1x8x8xf32>, vector<1x8x8xf32>, vector<1x8x8xf32>, vector<1x8x8xf32>, vector<1x8x8xf32>, vector<1x8x8xf32> -> vector<8x8x8xf32>
    %54 = arith.truncf %53 : vector<8x8x8xf32> to vector<8x8x8xbf16>
    %55 = vector.extract_strided_slice %18 {offsets = [0, 0], sizes = [8, 8], strides = [1, 1]} : vector<16x32xf32> to vector<8x8xf32>
    %56 = vector.extract_strided_slice %18 {offsets = [8, 0], sizes = [8, 8], strides = [1, 1]} : vector<16x32xf32> to vector<8x8xf32>
    %57 = vector.extract_strided_slice %18 {offsets = [0, 8], sizes = [8, 8], strides = [1, 1]} : vector<16x32xf32> to vector<8x8xf32>
    %58 = vector.extract_strided_slice %18 {offsets = [8, 8], sizes = [8, 8], strides = [1, 1]} : vector<16x32xf32> to vector<8x8xf32>
    %59 = vector.extract_strided_slice %18 {offsets = [0, 16], sizes = [8, 8], strides = [1, 1]} : vector<16x32xf32> to vector<8x8xf32>
    %60 = vector.extract_strided_slice %18 {offsets = [8, 16], sizes = [8, 8], strides = [1, 1]} : vector<16x32xf32> to vector<8x8xf32>
    %61 = vector.extract_strided_slice %18 {offsets = [0, 24], sizes = [8, 8], strides = [1, 1]} : vector<16x32xf32> to vector<8x8xf32>
    %62 = vector.extract_strided_slice %18 {offsets = [8, 24], sizes = [8, 8], strides = [1, 1]} : vector<16x32xf32> to vector<8x8xf32>
    %63 = vector.shape_cast %55 : vector<8x8xf32> to vector<1x8x8xf32>
    %64 = vector.shape_cast %56 : vector<8x8xf32> to vector<1x8x8xf32>
    %65 = vector.shape_cast %57 : vector<8x8xf32> to vector<1x8x8xf32>
    %66 = vector.shape_cast %58 : vector<8x8xf32> to vector<1x8x8xf32>
    %67 = vector.shape_cast %59 : vector<8x8xf32> to vector<1x8x8xf32>
    %68 = vector.shape_cast %60 : vector<8x8xf32> to vector<1x8x8xf32>
    %69 = vector.shape_cast %61 : vector<8x8xf32> to vector<1x8x8xf32>
    %70 = vector.shape_cast %62 : vector<8x8xf32> to vector<1x8x8xf32>
    %71 = tpu.concatenate %63, %64, %65, %66, %67, %68, %69, %70 in 0 : vector<1x8x8xf32>, vector<1x8x8xf32>, vector<1x8x8xf32>, vector<1x8x8xf32>, vector<1x8x8xf32>, vector<1x8x8xf32>, vector<1x8x8xf32>, vector<1x8x8xf32> -> vector<8x8x8xf32>
    %72 = arith.truncf %71 : vector<8x8x8xf32> to vector<8x8x8xbf16>
    "tpu.trace_start"() <{level = 10 : i32, message = "gnd,gmd->gnm"}> : () -> ()
    %cst_15 = arith.constant dense<0.000000e+00> : vector<8x8x8xf32>
    %73 = tpu.matmul %36, %54, %cst_15 {dimension_numbers = #tpu.dot_dimension_numbers<[2], [2], [1], [1], [0, 0, 0, 1, 1, 1], [0], [0]>} : vector<8x8x8xbf16>, vector<8x8x8xbf16>, vector<8x8x8xf32> -> vector<8x8x8xf32>
    "tpu.trace_stop"() : () -> ()
    %cst_16 = arith.constant dense<0xFF800000> : vector<8x8xf32>
    %74 = vector.multi_reduction <maximumf>, %73, %cst_16 [2] : vector<8x8x8xf32> to vector<8x8xf32>
    %75 = vector.shape_cast %74 : vector<8x8xf32> to vector<8x8x1xf32>
    %76 = vector.broadcast %75 : vector<8x8x1xf32> to vector<8x8x8xf32>
    %77 = arith.subf %73, %76 : vector<8x8x8xf32>
    %78 = math.exp %77 : vector<8x8x8xf32>
    %cst_17 = arith.constant dense<0.000000e+00> : vector<8x8xf32>
    %79 = vector.multi_reduction <add>, %78, %cst_17 [2] : vector<8x8x8xf32> to vector<8x8xf32>
    %80 = vector.shape_cast %79 : vector<8x8xf32> to vector<8x8x1xf32>
    %81 = tpu.reciprocal %80 {approx = true} : vector<8x8x1xf32> -> vector<8x8x1xf32>
    %82 = vector.broadcast %81 : vector<8x8x1xf32> to vector<8x8x8xf32>
    %83 = arith.mulf %78, %82 : vector<8x8x8xf32>
    %cst_18 = arith.constant 5.000000e-01 : f32
    %84 = vector.broadcast %cst_18 : f32 to vector<8x8x8xf32>
    %85 = arith.mulf %83, %84 : vector<8x8x8xf32>
    %86 = vector.shape_cast %12 : vector<8x8xf32> to vector<1x8x8xf32>
    %87 = vector.broadcast %86 : vector<1x8x8xf32> to vector<8x8x8xf32>
    %88 = arith.addf %85, %87 : vector<8x8x8xf32>
    %89 = arith.truncf %88 : vector<8x8x8xf32> to vector<8x8x8xbf16>
    "tpu.trace_start"() <{level = 10 : i32, message = "gnm,gmd->gnd"}> : () -> ()
    %cst_19 = arith.constant dense<0.000000e+00> : vector<8x8x8xf32>
    %90 = tpu.matmul %89, %72, %cst_19 {dimension_numbers = #tpu.dot_dimension_numbers<[2], [1], [1], [2], [0, 0, 0, 1, 1, 2], [0], [0]>} : vector<8x8x8xbf16>, vector<8x8x8xbf16>, vector<8x8x8xf32> -> vector<8x8x8xf32>
    "tpu.trace_stop"() : () -> ()
    %91 = vector.extract_strided_slice %90 {offsets = [0, 0, 0], sizes = [1, 8, 8], strides = [1, 1, 1]} : vector<8x8x8xf32> to vector<1x8x8xf32>
    %92 = vector.shape_cast %91 : vector<1x8x8xf32> to vector<8x8xf32>
    %93 = vector.extract_strided_slice %90 {offsets = [1, 0, 0], sizes = [1, 8, 8], strides = [1, 1, 1]} : vector<8x8x8xf32> to vector<1x8x8xf32>
    %94 = vector.shape_cast %93 : vector<1x8x8xf32> to vector<8x8xf32>
    %95 = tpu.concatenate %92, %94 in 0 : vector<8x8xf32>, vector<8x8xf32> -> vector<16x8xf32>
    %96 = vector.extract_strided_slice %90 {offsets = [2, 0, 0], sizes = [1, 8, 8], strides = [1, 1, 1]} : vector<8x8x8xf32> to vector<1x8x8xf32>
    %97 = vector.shape_cast %96 : vector<1x8x8xf32> to vector<8x8xf32>
    %98 = vector.extract_strided_slice %90 {offsets = [3, 0, 0], sizes = [1, 8, 8], strides = [1, 1, 1]} : vector<8x8x8xf32> to vector<1x8x8xf32>
    %99 = vector.shape_cast %98 : vector<1x8x8xf32> to vector<8x8xf32>
    %100 = tpu.concatenate %97, %99 in 0 : vector<8x8xf32>, vector<8x8xf32> -> vector<16x8xf32>
    %101 = vector.extract_strided_slice %90 {offsets = [4, 0, 0], sizes = [1, 8, 8], strides = [1, 1, 1]} : vector<8x8x8xf32> to vector<1x8x8xf32>
    %102 = vector.shape_cast %101 : vector<1x8x8xf32> to vector<8x8xf32>
    %103 = vector.extract_strided_slice %90 {offsets = [5, 0, 0], sizes = [1, 8, 8], strides = [1, 1, 1]} : vector<8x8x8xf32> to vector<1x8x8xf32>
    %104 = vector.shape_cast %103 : vector<1x8x8xf32> to vector<8x8xf32>
    %105 = tpu.concatenate %102, %104 in 0 : vector<8x8xf32>, vector<8x8xf32> -> vector<16x8xf32>
    %106 = vector.extract_strided_slice %90 {offsets = [6, 0, 0], sizes = [1, 8, 8], strides = [1, 1, 1]} : vector<8x8x8xf32> to vector<1x8x8xf32>
    %107 = vector.shape_cast %106 : vector<1x8x8xf32> to vector<8x8xf32>
    %108 = vector.extract_strided_slice %90 {offsets = [7, 0, 0], sizes = [1, 8, 8], strides = [1, 1, 1]} : vector<8x8x8xf32> to vector<1x8x8xf32>
    %109 = vector.shape_cast %108 : vector<1x8x8xf32> to vector<8x8xf32>
    %110 = tpu.concatenate %107, %109 in 0 : vector<8x8xf32>, vector<8x8xf32> -> vector<16x8xf32>
    %111 = tpu.concatenate %95, %100, %105, %110 in 1 : vector<16x8xf32>, vector<16x8xf32>, vector<16x8xf32>, vector<16x8xf32> -> vector<16x32xf32>
    %112 = arith.truncf %111 : vector<16x32xf32> to vector<16x32xbf16>
    %cst_20 = arith.constant dense<0.000000e+00> : vector<16x32xf32>
    %113 = tpu.matmul %112, %4, %cst_20 {dimension_numbers = #tpu.dot_dimension_numbers<[1], [0], [0], [1], [0, 0, 1, 1], [], []>} : vector<16x32xbf16>, vector<32x32xbf16>, vector<16x32xf32> -> vector<16x32xf32>
    %114 = vector.broadcast %6 : vector<1x32xf32> to vector<16x32xf32>
    %115 = arith.addf %113, %114 : vector<16x32xf32>
    %116 = arith.addf %115, %1 : vector<16x32xf32>
    %cst_21 = arith.constant dense<0.000000e+00> : vector<16xf32>
    %117 = vector.multi_reduction <add>, %116, %cst_21 [1] : vector<16x32xf32> to vector<16xf32>
    %118 = vector.shape_cast %117 : vector<16xf32> to vector<16x1xf32>
    %cst_22 = arith.constant 3.200000e+01 : f32
    %119 = vector.broadcast %cst_22 : f32 to vector<16x1xf32>
    %120 = arith.divf %118, %119 : vector<16x1xf32>
    %121 = vector.broadcast %120 : vector<16x1xf32> to vector<16x32xf32>
    %122 = arith.subf %116, %121 : vector<16x32xf32>
    %123 = arith.mulf %122, %122 : vector<16x32xf32>
    %cst_23 = arith.constant dense<0.000000e+00> : vector<16xf32>
    %124 = vector.multi_reduction <add>, %123, %cst_23 [1] : vector<16x32xf32> to vector<16xf32>
    %125 = vector.shape_cast %124 : vector<16xf32> to vector<16x1xf32>
    %cst_24 = arith.constant 3.200000e+01 : f32
    %126 = vector.broadcast %cst_24 : f32 to vector<16x1xf32>
    %127 = arith.divf %125, %126 : vector<16x1xf32>
    %128 = vector.broadcast %120 : vector<16x1xf32> to vector<16x32xf32>
    %129 = arith.subf %116, %128 : vector<16x32xf32>
    %cst_25 = arith.constant 9.99999974E-6 : f32
    %130 = vector.broadcast %cst_25 : f32 to vector<16x1xf32>
    %131 = arith.addf %127, %130 : vector<16x1xf32>
    %132 = math.rsqrt %131 : vector<16x1xf32>
    %133 = vector.broadcast %132 : vector<16x1xf32> to vector<16x32xf32>
    %134 = arith.mulf %129, %133 : vector<16x32xf32>
    %135 = vector.broadcast %7 : vector<1x32xf32> to vector<16x32xf32>
    %136 = arith.mulf %134, %135 : vector<16x32xf32>
    %137 = vector.broadcast %8 : vector<1x32xf32> to vector<16x32xf32>
    %138 = arith.addf %136, %137 : vector<16x32xf32>
    %cst_26 = arith.constant 0.000000e+00 : f32
    %139 = vector.broadcast %cst_26 : f32 to vector<16x32xf32>
    %140 = arith.cmpf ogt, %138, %139 : vector<16x32xf32>
    %141 = vector.broadcast %9 : vector<1x32xf32> to vector<16x32xf32>
    %142 = arith.mulf %141, %138 : vector<16x32xf32>
    %143 = arith.select %140, %138, %142 : vector<16x32xi1>, vector<16x32xf32>
    %cst_27 = arith.constant 0.000000e+00 : f32
    %144 = vector.broadcast %cst_27 : f32 to vector<16x96xf32>
    %145 = tpu.concatenate %143, %144 in 1 : vector<16x32xf32>, vector<16x96xf32> -> vector<16x128xf32>
    %146 = vector.shape_cast %145 : vector<16x128xf32> to vector<2x8x128xf32>
    %c0_28 = arith.constant 0 : index
    %c0_29 = arith.constant 0 : index
    %c0_30 = arith.constant 0 : index
    %147 = vector.load %arg6[%c0_28, %c0_29, %c0_30] : memref<2x8x128xf32, #tpu.memory_space<vmem>>, vector<2x8x128xf32>
    tpu.vector_store %arg6[%c0_28, %c0_29, %c0_30], %146 {strides = array<i32>} : memref<2x8x128xf32, #tpu.memory_space<vmem>>, vector<2x8x128xf32>,
    return
  }
  func.func @transform_0(%arg0: i32) -> (i32, i32, i32) {
    %c0_i32 = arith.constant 0 : i32
    %c0_i32_0 = arith.constant 0 : i32
    %c0_i32_1 = arith.constant 0 : i32
    return %arg0, %c0_i32, %c0_i32_0 : i32, i32, i32
  }
  func.func @transform_1(%arg0: i32) -> (i32, i32) {
    %c0_i32 = arith.constant 0 : i32
    %c0_i32_0 = arith.constant 0 : i32
    %c0_i32_1 = arith.constant 0 : i32
    return %c0_i32, %c0_i32_0 : i32, i32
  }
  func.func @transform_2(%arg0: i32) -> (i32, i32) {
    %c0_i32 = arith.constant 0 : i32
    %c0_i32_0 = arith.constant 0 : i32
    %c0_i32_1 = arith.constant 0 : i32
    return %c0_i32, %c0_i32_0 : i32, i32
  }
  func.func @transform_3(%arg0: i32) -> (i32, i32) {
    %c0_i32 = arith.constant 0 : i32
    %c0_i32_0 = arith.constant 0 : i32
    %c0_i32_1 = arith.constant 0 : i32
    return %c0_i32, %c0_i32_0 : i32, i32
  }
  func.func @transform_4(%arg0: i32) -> (i32, i32) {
    %c0_i32 = arith.constant 0 : i32
    %c0_i32_0 = arith.constant 0 : i32
    %c0_i32_1 = arith.constant 0 : i32
    return %c0_i32, %c0_i32_0 : i32, i32
  }
  func.func @transform_5(%arg0: i32) -> (i32, i32, i32) {
    %c0_i32 = arith.constant 0 : i32
    %c0_i32_0 = arith.constant 0 : i32
    %c0_i32_1 = arith.constant 0 : i32
    return %arg0, %c0_i32, %c0_i32_0 : i32, i32, i32
  }
}

</mosaic_0001>

<bundles_post_ra>
// kernel: tpu_custom_call.1
= control target key start
LH: loop header
LB: loop body
LE: loop exit
PB: predicated region body
PF: predicated region fallthrough
CT: control target
= control target key end

     0   :  { %10 = vsyncpa [#allocation3], 0  ;;  %s1926_s0 = inlined_call_operand.hbm [shape: f32[2,8,32], index: 0, kind: input, shape index: {}]   ;;  %s1927_s1 = inlined_call_operand.hbm [shape: f32[8,8], index: 1, kind: input, shape index: {}]   ;;  %s1928_s2 = inlined_call_operand.hbm [shape: bf16[32,96], index: 2, kind: input, shape index: {}]   ;;  %s1929_s3 = inlined_call_operand.hbm [shape: bf16[32,32], index: 3, kind: input, shape index: {}]   ;;  %s1930_s4 = inlined_call_operand.hbm [shape: f32[8,128], index: 4, kind: input, shape index: {}]   ;;  %s1931_s5 = inlined_call_operand.hbm [shape: f32[2,8,128], index: 5, kind: output, shape index: {}]  }
   0x1   :  { %11 = vsyncpa [#allocation6], 0 }
   0x2   :  { %12 = vsyncpa [#allocation9], 0 }
   0x3   :  { %13 = vsyncpa [#allocation4], 0  ;;  %s1643_s18 = smov [#allocation5]  }
   0x4   :  { %s32_s19 = sshll.u32 %s1643_s18, 4  ;;  %s33_s19 = int_to_ptr.vmem [resolvable:$true] %s32_s19 }
   0x5   :  { %s1523_s20 = scalar_lea.vmem %s33_s19, 128  ;;  %p1528_p1 = scmp.lt.s32.totalorder %s33_s19, %s33_s19 }
   0x6   :  { %p1524_p0 = scmp.ne.s32.totalorder %s33_s19, %s1523_s20  ;;  %p1529_p2 = scmp.lt.s32.totalorder %s1523_s20, %s1523_s20 }
   0x8   :  { %p1530_p3 = por %p1529_p2, %p1528_p1 }
   0xa   :  { %p1531_p4 = pnand %p1530_p3, %p1524_p0 }
   0xc   :  { %1534 = shalt.err (!%p1531_p4)
}
   0xd   :  { %35 = dma.hbm_to_vmem [thread:$0]  %s1927_s1, 128, %s33_s19, [#allocation6]  }
   0xe   :  { %s1644_s23 = smov [#allocation8]   ;;  %s1645_s25 = smov [#allocation2]  }
   0xf   :  { %s53_s24 = sshll.u32 %s1644_s23, 4  ;;  %s19_s26 = sshll.u32 %s1645_s25, 4  ;;  %s54_s24 = int_to_ptr.vmem [resolvable:$true] %s53_s24  ;;  %s20_s26 = int_to_ptr.vmem [resolvable:$true] %s19_s26 }
  0x10   :  { %s1543_s27 = scalar_lea.vmem %s54_s24, 256  ;;  %p1548_p6 = scmp.lt.s32.totalorder %s54_s24, %s54_s24 }
  0x11   :  { %p1544_p5 = scmp.ne.s32.totalorder %s54_s24, %s1543_s27  ;;  %p1549_p7 = scmp.lt.s32.totalorder %s1543_s27, %s1543_s27 }
  0x13   :  { %p1550_p8 = por %p1549_p7, %p1548_p6 }
  0x15   :  { %p1551_p9 = pnand %p1550_p8, %p1544_p5 }
  0x17   :  { %1554 = shalt.err (!%p1551_p9)
}
  0x18   :  { %s1646_s28 = smov 64   ;;  %s1647_s29 = smov 4  }
  0x19   :  { %59 = dma.hbm_to_vmem [thread:$0]  %s1929_s3, 256, %s54_s24, [#allocation9], %s1646_s28, %s1646_s28, %s1647_s29  }
  0x1a   :  { %s1563_s1 = scalar_lea.vmem %s20_s26, 256  ;;  %p1568_p11 = scmp.lt.s32.totalorder %s20_s26, %s20_s26 }
  0x1b   :  { %p1564_p10 = scmp.ne.s32.totalorder %s20_s26, %s1563_s1  ;;  %p1569_p12 = scmp.lt.s32.totalorder %s1563_s1, %s1563_s1 }
  0x1d   :  { %p1570_p13 = por %p1569_p12, %p1568_p11 }
  0x1f   :  { %p1571_p0 = pnand %p1570_p13, %p1564_p10 }
  0x21   :  { %1574 = shalt.err (!%p1571_p0)
}
  0x22   :  { %s1648_s7 = smov 128   ;;  %s1649_s8 = smov 8  }
  0x23   :  { %25 = dma.hbm_to_vmem [thread:$0]  %s1926_s0, 256, %s20_s26, [#allocation3], %s1648_s7, %s1648_s7, %s1649_s8  }
  0x24   :  { %s1650_s11 = smov [#allocation7]   ;;  %s1651_s3 = smov [#allocation10]  }
  0x25   :  { %s41_s12 = sshll.u32 %s1650_s11, 4  ;;  %s66_s13 = sshll.u32 %s1651_s3, 4  ;;  %s42_s12 = int_to_ptr.vmem [resolvable:$true] %s41_s12  ;;  %s67_s13 = int_to_ptr.vmem [resolvable:$true] %s66_s13 }
  0x26   :  { %s1583_s14 = scalar_lea.vmem %s42_s12, 256  ;;  %p1588_p2 = scmp.lt.s32.totalorder %s42_s12, %s42_s12 }
  0x27   :  { %p1584_p1 = scmp.ne.s32.totalorder %s42_s12, %s1583_s14  ;;  %p1589_p3 = scmp.lt.s32.totalorder %s1583_s14, %s1583_s14 }
  0x29   :  { %p1590_p4 = por %p1589_p3, %p1588_p2 }
  0x2b   :  { %p1591_p5 = pnand %p1590_p4, %p1584_p1 }
  0x2d   :  { %1594 = shalt.err (!%p1591_p5)
}
  0x2e   :  { %47 = dma.hbm_to_vmem [thread:$0]  %s1928_s2, 256, %s42_s12, [#allocation6], %s1646_s28, %s1646_s28, %s1647_s29  }
  0x2f   :  { %s1603_s0 = scalar_lea.vmem %s67_s13, 128  ;;  %p1608_p7 = scmp.lt.s32.totalorder %s67_s13, %s67_s13 }
  0x30   :  { %p1604_p6 = scmp.ne.s32.totalorder %s67_s13, %s1603_s0  ;;  %p1609_p8 = scmp.lt.s32.totalorder %s1603_s0, %s1603_s0 }
  0x32   :  { %p1610_p9 = por %p1609_p8, %p1608_p7 }
  0x34   :  { %p1611_p10 = pnand %p1610_p9, %p1604_p6 }
  0x36   :  { %1614 = shalt.err (!%p1611_p10)
}
  0x37   :  { %69 = dma.hbm_to_vmem [thread:$0]  %s1930_s4, 128, %s67_s13, [#allocation9]  }
  0x38   :  { %1635 = dma.done.wait [#allocation3], 256  }
  0x39   :  { %1636 = vsyncadd [#allocation3], 4294967040 }
  0x3a   :  { %1637 = dma.done.wait [#allocation6], 384  }
  0x3b   :  { %1638 = vsyncadd [#allocation6], 4294966912 }
  0x3c   :  { %1639 = dma.done.wait [#allocation9], 384  }
  0x3d   :  { %1640 = vsyncadd [#allocation9], 4294966912  ;;  %v1652_v0 = vmov 0.0   ;;  %vm1653_vm0 = vmmov 0   ;;  %v1475_v1 = vld [vmem:[#allocation7 + $0x8] sm:$0xff]   ;;  %v1476_v2 = vld [vmem:[#allocation7] sm:$0xff]  }
  0x3e   :  { %1315 = vmatprep.subr.bf16.mxu0 %v1652_v0  ;;  %1319 = vmatprep.mubr.msk.bf16.mxu0 %vm1653_vm0, %v1652_v0  ;;  %v1719_v3 = vld [vmem:[#allocation2] sm:$0xff]  ;;  %v1721_v4 = vld [vmem:[#allocation2 + $0x8] sm:$0xff]  ;;  %vm120_vm1 = vcmask 261120   ;;  %v1250_v7 = vld [vmem:[#allocation10] ss:$0 sm:$0xff]  ;;  %s1654_s2 = smov 104  }
  0x3f   :  { %1323 = vmatprep.subr.bf16.mxu1 %v1652_v0  ;;  %1325 = vmatprep.mubr.msk.bf16.mxu1 %vm1653_vm0, %v1652_v0  ;;  %v88_v5 = vpack.c.bf16 %v1721_v4, %v1719_v3  ;;  %s1655_s4 = smov 120   ;;  %s1656_s19 = smov 96   ;;  %vm196_vm2 = vcmask 64512   ;;  %vm703_vm3 = vcmask 1043456   ;;  %vm1109_vm4 = vcmask 130048  }
  0x40   :  { %1316 = vmatpush3.bf16.msra.mxu0 %v1475_v1  ;;  %s1657_s20 = smov 112   ;;  %s1658_s21 = smov 16   ;;  %vm1112_vm5 = vcmask 195584  }
  0x41   :  { %1317 = vmatprep.subr.bf16.mxu0 %v1652_v0  ;;  %s1659_s22 = smov 24   ;;  %s1660_s23 = smov [#allocation11]  }
  0x42   :  { %s1236_s24 = sshll.u32 %s1660_s23, 4  ;;  %s1237_s24 = int_to_ptr.vmem [resolvable:$true] %s1236_s24 }
  0x43   :  { %s1615_s25 = scalar_lea.vmem %s1237_s24, 256  ;;  %p1620_p12 = scmp.lt.s32.totalorder %s1237_s24, %s1237_s24 }
  0x44   :  { %1318 = vmatpush3.bf16.msra.mxu0 %v1476_v2  ;;  %p1616_p11 = scmp.ne.s32.totalorder %s1237_s24, %s1615_s25  ;;  %p1621_p13 = scmp.lt.s32.totalorder %s1615_s25, %s1615_s25 }
  0x45   :  { %1329 = vmatprep.subr.bf16.mxu0 %v1652_v0 }
  0x46   :  { %p1622_p0 = por %p1621_p13, %p1620_p12 }
  0x47   :  { %1320 = vmatmul.mubr.msk.bf16.vlgmr.msra.gmra.mxu0 %vm120_vm1, %v88_v5 }
  0x48   :  { %1331 = vmatprep.mubr.msk.bf16.mxu0 %vm1653_vm0, %v1652_v0  ;;  %p1623_p1 = pnand %p1622_p0, %p1616_p11 }
 0x107   :  { %v158_v6 = vpop.f32.mrf.mxu0 }
 0x108   :  { %v159_v10 = vadd.f32 %v1250_v7, %v158_v6 }
 0x109   :  { %v1321_v8 = vpop.f32.mrf.mxu0 }
 0x10a   :  { %v185_v14 = vpack.c.bf16 %v159_v10, %v159_v10 }
 0x10b   :  { %v161_v9 = vpop.f32.mrf.mxu0 }
 0x10c   :  { %v162_v11 = vadd.f32 %v1250_v7, %v161_v9 }
 0x10d   :  { %v1322_v12 = vpop.f32.mrf.mxu0 }
 0x10e   :  { %v1455_v13 = vpack.i.bf16 %v162_v11, %v159_v10  ;;  %v186_v15 = vpack.c.bf16 %v162_v11, %v162_v11 }
 0x110   :  { %1456 = vrot.lane.b32.xlu1 %v1455_v13, %s1654_s2  ;;  %1446 = vrot.lane.b32.xlu0 %v1455_v13, %s1655_s4 }
 0x114   :  { %194 = vrot.lane.b32.xlu1 %v185_v14, %s1656_s19  ;;  %1451 = vrot.lane.b32.xlu0 %v1455_v13, %s1657_s20 }
 0x118   :  { %244 = vrot.lane.b32.xlu0 %v186_v15, %s1656_s19 }
 0x182   :  { %v1457_v16 = vpop.permute.xlu1 %1456  ;;  %v1447_v17 = vpop.permute.xlu0 %1446 }
 0x183   :  { %v1449_v18 = vunpack.i.h.bf16 %v1447_v17  ;;  %v1448_v19 = vunpack.i.l.bf16 %v1447_v17  ;;  %v1458_v27 = vunpack.i.l.bf16 %v1457_v16  ;;  %v1459_v30 = vunpack.i.h.bf16 %v1457_v16 }
 0x185   :  { %v1732_v20 = vpack.c.bf16 %v1449_v18, %v1449_v18  ;;  %v1734_v21 = vpack.c.bf16 %v1448_v19, %v1448_v19  ;;  %v1751_v33 = vpack.c.bf16 %v1458_v27, %v1458_v27  ;;  %v1754_v34 = vpack.c.bf16 %v1459_v30, %v1459_v30 }
 0x186   :  { %v195_v22 = vpop.permute.xlu1 %194  ;;  %v1452_v23 = vpop.permute.xlu0 %1451 }
 0x187   :  { %v1454_v24 = vunpack.i.h.bf16 %v1452_v23  ;;  %v1453_v25 = vunpack.i.l.bf16 %v1452_v23  ;;  %293 = vrot.lane.b32.xlu1 %v1734_v21, %s1656_s19  ;;  %342 = vrot.lane.b32.xlu0 %v1732_v20, %s1656_s19  ;;  %v201_v26 = vsel %vm196_vm2, %v195_v22, 0 }
 0x188   :  { %1324 = vmatpush3.bf16.xpose.msra.mxu1 %v201_v26 }
 0x189   :  { %v1741_v28 = vpack.c.bf16 %v1454_v24, %v1454_v24  ;;  %v1743_v29 = vpack.c.bf16 %v1453_v25, %v1453_v25  ;;  %1335 = vmatprep.subr.bf16.mxu1 %v1652_v0 }
 0x18a   :  { %v245_v31 = vpop.permute.xlu0 %244 }
 0x18b   :  { %v250_v32 = vsel %vm196_vm2, %v245_v31, 0  ;;  %391 = vrot.lane.b32.xlu1 %v1743_v29, %s1656_s19  ;;  %440 = vrot.lane.b32.xlu0 %v1741_v28, %s1656_s19 }
 0x18c   :  { %1330 = vmatpush3.bf16.xpose.msra.mxu0 %v250_v32 }
 0x18d   :  { %1341 = vmatprep.subr.bf16.mxu0 %v1652_v0 }
 0x18f   :  { %1326 = vmatmul.mubr.msk.bf16.vlgmr.msra.gmra.mxu1 %vm196_vm2, %v185_v14  ;;  %489 = vrot.lane.b32.xlu1 %v1751_v33, %s1656_s19 }
 0x190   :  { %538 = vrot.lane.b32.xlu0 %v1754_v34, %s1656_s19  ;;  %1337 = vmatprep.mubr.msk.bf16.mxu1 %vm1653_vm0, %v1652_v0 }
 0x193   :  { %747 = vrot.lane.b32.xlu1 %v186_v15, %s1646_s28  ;;  %1332 = vmatmul.mubr.msk.bf16.vlgmr.msra.gmra.mxu0 %vm196_vm2, %v186_v15 }
 0x194   :  { %698 = vrot.lane.b32.xlu0 %v185_v14, %s1646_s28  ;;  %1343 = vmatprep.mubr.msk.bf16.mxu0 %vm1653_vm0, %v1652_v0 }
 0x1f9   :  { %v294_v35 = vpop.permute.xlu1 %293  ;;  %v343_v36 = vpop.permute.xlu0 %342 }
 0x1fa   :  { %v299_v37 = vsel %vm196_vm2, %v294_v35, 0  ;;  %v348_v38 = vsel %vm196_vm2, %v343_v36, 0 }
 0x1fb   :  { %1336 = vmatpush3.bf16.xpose.msra.mxu1 %v299_v37  ;;  %1342 = vmatpush3.bf16.xpose.msra.mxu0 %v348_v38 }
 0x1fc   :  { %1347 = vmatprep.subr.bf16.mxu1 %v1652_v0  ;;  %1353 = vmatprep.subr.bf16.mxu0 %v1652_v0 }
 0x1fd   :  { %v392_v39 = vpop.permute.xlu1 %391  ;;  %v441_v40 = vpop.permute.xlu0 %440 }
 0x1fe   :  { %v397_v41 = vsel %vm196_vm2, %v392_v39, 0  ;;  %v446_v42 = vsel %vm196_vm2, %v441_v40, 0 }
 0x201   :  { %v490_v43 = vpop.permute.xlu1 %489 }
 0x202   :  { %1338 = vmatmul.mubr.msk.bf16.vlgmr.msra.gmra.mxu1 %vm196_vm2, %v1734_v21  ;;  %1344 = vmatmul.mubr.msk.bf16.vlgmr.msra.gmra.mxu0 %vm196_vm2, %v1732_v20  ;;  %v539_v44 = vpop.permute.xlu0 %538  ;;  %v495_v45 = vsel %vm196_vm2, %v490_v43, 0 }
 0x203   :  { %1348 = vmatpush3.bf16.xpose.msra.mxu1 %v397_v41  ;;  %1354 = vmatpush3.bf16.xpose.msra.mxu0 %v446_v42  ;;  %v544_v46 = vsel %vm196_vm2, %v539_v44, 0 }
 0x204   :  { %1349 = vmatprep.mubr.msk.bf16.mxu1 %vm1653_vm0, %v1652_v0  ;;  %1355 = vmatprep.mubr.msk.bf16.mxu0 %vm1653_vm0, %v1652_v0 }
 0x205   :  { %1359 = vmatprep.subr.bf16.mxu1 %v1652_v0  ;;  %1365 = vmatprep.subr.bf16.mxu0 %v1652_v0  ;;  %v748_v47 = vpop.permute.xlu1 %747 }
 0x206   :  { %v699_v48 = vpop.permute.xlu0 %698  ;;  %v753_v49 = vsel %vm703_vm3, %v748_v47, 0 }
 0x207   :  { %v705_v50 = vsel %vm703_vm3, %v699_v48, 0 }
 0x20a   :  { %1350 = vmatmul.mubr.msk.bf16.vlgmr.msra.gmra.mxu1 %vm196_vm2, %v1743_v29  ;;  %1356 = vmatmul.mubr.msk.bf16.vlgmr.msra.gmra.mxu0 %vm196_vm2, %v1741_v28 }
 0x20b   :  { %1360 = vmatpush3.bf16.xpose.msra.mxu1 %v495_v45  ;;  %1366 = vmatpush3.bf16.xpose.msra.mxu0 %v544_v46 }
 0x20c   :  { %1361 = vmatprep.mubr.msk.bf16.mxu1 %vm1653_vm0, %v1652_v0  ;;  %1367 = vmatprep.mubr.msk.bf16.mxu0 %vm1653_vm0, %v1652_v0 }
 0x20d   :  { %1371 = vmatprep.subr.bf16.mxu1 %v1652_v0  ;;  %1377 = vmatprep.subr.bf16.mxu0 %v1652_v0 }
 0x212   :  { %1362 = vmatmul.mubr.msk.bf16.vlgmr.msra.gmra.mxu1 %vm196_vm2, %v1751_v33  ;;  %1368 = vmatmul.mubr.msk.bf16.vlgmr.msra.gmra.mxu0 %vm196_vm2, %v1754_v34 }
 0x213   :  { %1372 = vmatpush3.bf16.msra.mxu1 %v705_v50  ;;  %1378 = vmatpush3.bf16.msra.mxu0 %v753_v49 }
 0x214   :  { %1373 = vmatprep.mubr.msk.bf16.mxu1 %vm1653_vm0, %v1652_v0  ;;  %1379 = vmatprep.mubr.msk.bf16.mxu0 %vm1653_vm0, %v1652_v0 }
 0x215   :  { %1383 = vmatprep.subr.bf16.mxu1 %v1652_v0  ;;  %1389 = vmatprep.subr.bf16.mxu0 %v1652_v0 }
 0x24f   :  { %v237_v51 = vpop.f32.mrf.mxu1 }
 0x250   :  { %v586_v52 = vsel %vm196_vm2, %v237_v51, -inf }
 0x251   :  { %v1327_v53 = vpop.f32.mrf.mxu1  ;;  %587 = vmax.xlane.f32.xlu1 %v586_v52 }
 0x253   :  { %v240_v54 = vpop.f32.mrf.mxu1  ;;  %v286_v55 = vpop.f32.mrf.mxu0 }
 0x254   :  { %v589_v56 = vsel %vm196_vm2, %v286_v55, -inf }
 0x255   :  { %v1328_v57 = vpop.f32.mrf.mxu1  ;;  %590 = vmax.xlane.f32.xlu0 %v589_v56  ;;  %v1333_v58 = vpop.f32.mrf.mxu0 }
 0x257   :  { %v289_v59 = vpop.f32.mrf.mxu0 }
 0x259   :  { %v1334_v60 = vpop.f32.mrf.mxu0 }
 0x2c2   :  { %v335_v61 = vpop.f32.mrf.mxu1  ;;  %v384_v62 = vpop.f32.mrf.mxu0 }
 0x2c3   :  { %v592_v63 = vsel %vm196_vm2, %v335_v61, -inf  ;;  %v595_v1 = vsel %vm196_vm2, %v384_v62, -inf }
 0x2c4   :  { %v1339_v2 = vpop.f32.mrf.mxu1  ;;  %593 = vmax.xlane.f32.xlu0 %v592_v63  ;;  %596 = vmax.xlane.f32.xlu1 %v595_v1  ;;  %v1345_v5 = vpop.f32.mrf.mxu0 }
 0x2c6   :  { %v338_v6 = vpop.f32.mrf.mxu1  ;;  %v387_v7 = vpop.f32.mrf.mxu0 }
 0x2c8   :  { %v1340_v8 = vpop.f32.mrf.mxu1  ;;  %v1346_v9 = vpop.f32.mrf.mxu0 }
 0x2ca   :  { %v433_v10 = vpop.f32.mrf.mxu1  ;;  %v1812_v11 = vpop.f32.mrf.mxu0 }
 0x2cb   :  { %v598_v12 = vsel %vm196_vm2, %v433_v10, -inf  ;;  %v601_v13 = vsel %vm196_vm2, %v1812_v11, -inf }
 0x2cc   :  { %v1351_v14 = vpop.f32.mrf.mxu1  ;;  %599 = vmax.xlane.f32.xlu0 %v598_v12  ;;  %602 = vmax.xlane.f32.xlu1 %v601_v13  ;;  %v1357_v15 = vpop.f32.mrf.mxu0 }
 0x2cd   :  { %v102_v15 = vld [vmem:[#allocation5] sm:$0xff] }
 0x2ce   :  { %v436_v16 = vpop.f32.mrf.mxu1  ;;  %v485_v17 = vpop.f32.mrf.mxu0 }
 0x2d0   :  { %v1352_v18 = vpop.f32.mrf.mxu1  ;;  %v1358_v19 = vpop.f32.mrf.mxu0 }
 0x2d1   :  { %v1854_v19 = vmul.f32 0.5, %v102_v15 }
 0x2d2   :  { %v531_v22 = vpop.f32.mrf.mxu1  ;;  %v580_v23 = vpop.f32.mrf.mxu0 }
 0x2d3   :  { %v604_v24 = vsel %vm196_vm2, %v531_v22, -inf  ;;  %v607_v25 = vsel %vm196_vm2, %v580_v23, -inf }
 0x2d4   :  { %v1363_v26 = vpop.f32.mrf.mxu1  ;;  %605 = vmax.xlane.f32.xlu0 %v604_v24  ;;  %608 = vmax.xlane.f32.xlu1 %v607_v25  ;;  %v1369_v27 = vpop.f32.mrf.mxu0 }
 0x2d6   :  { %v534_v30 = vpop.f32.mrf.mxu1  ;;  %v583_v31 = vpop.f32.mrf.mxu0 }
 0x2d8   :  { %v1364_v32 = vpop.f32.mrf.mxu1  ;;  %v1370_v35 = vpop.f32.mrf.mxu0 }
 0x2da   :  { %v588_v36 = vpop.xlane.xlu1 %587 }
 0x2db   :  { %v610_v38 = vsub.f32 %v237_v51, %v588_v36 }
 0x2dd   :  { %v618_v40 = vmul.f32 1.442695, %v610_v38 }
 0x2de   :  { %v591_v37 = vpop.xlane.xlu0 %590 }
 0x2df   :  { %v611_v39 = vsub.f32 %v286_v55, %v591_v37  ;;  %1479 = vpow2.f32 %v618_v40 }
 0x2e1   :  { %v620_v41 = vmul.f32 1.442695, %v611_v39 }
 0x2e3   :  { %1481 = vpow2.f32 %v620_v41 }
 0x2e5   :  { %795 = vrot.lane.b32.xlu1 %v1734_v21, %s1646_s28 }
 0x2ea   :  { %843 = vrot.lane.b32.xlu0 %v1732_v20, %s1646_s28 }
 0x2ec   :  { %v1480_v42 = vpop.eup %1479 }
 0x2ed   :  { %v634_v44 = vsel %vm196_vm2, %v1480_v42, 0.0 }
 0x2f0   :  { %v1482_v43 = vpop.eup %1481 }
 0x2f1   :  { %v637_v45 = vsel %vm196_vm2, %v1482_v43, 0.0 }
 0x309   :  { %635 = vadd.xlane.f32.xlu0 %v634_v44  ;;  %638 = vadd.xlane.f32.xlu1 %v637_v45 }
 0x34d   :  { %v594_v21 = vpop.xlane.xlu0 %593  ;;  %v597_v46 = vpop.xlane.xlu1 %596 }
 0x34e   :  { %v612_v47 = vsub.f32 %v335_v61, %v594_v21  ;;  %v613_v20 = vsub.f32 %v384_v62, %v597_v46 }
 0x350   :  { %v622_v48 = vmul.f32 1.442695, %v612_v47  ;;  %v624_v49 = vmul.f32 1.442695, %v613_v20 }
 0x352   :  { %1483 = vpow2.f32 %v622_v48 }
 0x353   :  { %1485 = vpow2.f32 %v624_v49 }
 0x355   :  { %v600_v50 = vpop.xlane.xlu0 %599  ;;  %v603_v59 = vpop.xlane.xlu1 %602 }
 0x356   :  { %v614_v51 = vsub.f32 %v433_v10, %v600_v50  ;;  %v615_v60 = vsub.f32 %v1812_v11, %v603_v59 }
 0x358   :  { %v626_v52 = vmul.f32 1.442695, %v614_v51  ;;  %v628_v62 = vmul.f32 1.442695, %v615_v60 }
 0x35a   :  { %1487 = vpow2.f32 %v626_v52 }
 0x35b   :  { %1489 = vpow2.f32 %v628_v62 }
 0x35d   :  { %v609_v61 = vpop.xlane.xlu1 %608  ;;  %v606_v63 = vpop.xlane.xlu0 %605 }
 0x35e   :  { %v617_v1 = vsub.f32 %v580_v23, %v609_v61  ;;  %v616_v2 = vsub.f32 %v531_v22, %v606_v63 }
 0x35f   :  { %v1825_v53 = vpop.eup %1483 }
 0x360   :  { %v1827_v54 = vpop.eup %1485  ;;  %v640_v55 = vsel %vm196_vm2, %v1825_v53, 0.0  ;;  %v632_v5 = vmul.f32 1.442695, %v617_v1  ;;  %v630_v6 = vmul.f32 1.442695, %v616_v2 }
 0x361   :  { %641 = vadd.xlane.f32.xlu0 %v640_v55  ;;  %v643_v56 = vsel %vm196_vm2, %v1827_v54, 0.0  ;;  %v844_v7 = vpop.permute.xlu0 %843  ;;  %v796_v8 = vpop.permute.xlu1 %795 }
 0x362   :  { %644 = vadd.xlane.f32.xlu1 %v643_v56  ;;  %1491 = vpow2.f32 %v632_v5  ;;  %v801_v31 = vsel %vm703_vm3, %v796_v8, 0  ;;  %v849_v32 = vsel %vm703_vm3, %v844_v7, 0 }
 0x363   :  { %1493 = vpow2.f32 %v630_v6 }
 0x367   :  { %v1833_v57 = vpop.eup %1487 }
 0x368   :  { %v646_v58 = vsel %vm196_vm2, %v1833_v57, 0.0  ;;  %v1842_v10 = vpop.eup %1489 }
 0x369   :  { %647 = vadd.xlane.f32.xlu0 %v646_v58 }
 0x36f   :  { %v1846_v11 = vpop.eup %1491 }
 0x370   :  { %v1848_v12 = vpop.eup %1493  ;;  %v655_v13 = vsel %vm196_vm2, %v1846_v11, 0.0 }
 0x371   :  { %v652_v14 = vsel %vm196_vm2, %v1848_v12, 0.0 }
 0x373   :  { %891 = vrot.lane.b32.xlu1 %v1743_v29, %s1646_s28 }
 0x37f   :  { %939 = vrot.lane.b32.xlu0 %v1741_v28, %s1646_s28  ;;  %v649_v28 = vsel %vm196_vm2, %v1842_v10, 0.0 }
 0x392   :  { %v636_v9 = vpop.xlane.xlu0 %635  ;;  %v639_v29 = vpop.xlane.xlu1 %638 }
 0x393   :  { %1495 = vrcp.f32 %v636_v9 }
 0x394   :  { %1497 = vrcp.f32 %v639_v29 }
 0x397   :  { %650 = vadd.xlane.f32.xlu1 %v649_v28 }
 0x39b   :  { %656 = vadd.xlane.f32.xlu1 %v655_v13 }
 0x39e   :  { %653 = vadd.xlane.f32.xlu0 %v652_v14 }
 0x3a0   :  { %v1496_v16 = vpop.eup %1495 }
 0x3a1   :  { %v1498_v17 = vpop.eup %1497  ;;  %v666_v18 = vmul.f32 %v1496_v16, %v1480_v42 }
 0x3a2   :  { %v667_v22 = vmul.f32 %v1498_v17, %v1482_v43 }
 0x3a3   :  { %v674_v23 = vmul.f32 0.5, %v666_v18 }
 0x3a4   :  { %v675_v24 = vmul.f32 0.5, %v667_v22 }
 0x3a5   :  { %v682_v25 = vadd.f32 %v674_v23, %v1854_v19 }
 0x3a6   :  { %v683_v26 = vadd.f32 %v675_v24, %v1854_v19 }
 0x3a7   :  { %v690_v27 = vpack.c.bf16 %v682_v25, %v682_v25 }
 0x3a8   :  { %v691_v30 = vpack.c.bf16 %v683_v26, %v683_v26 }
 0x3a9   :  { %1374 = vmatmul.mubr.msk.bf16.vlgmr.msra.gmra.mxu1 %vm196_vm2, %v690_v27 }
 0x3aa   :  { %1380 = vmatmul.mubr.msk.bf16.vlgmr.msra.gmra.mxu0 %vm196_vm2, %v691_v30  ;;  %1384 = vmatpush3.bf16.msra.mxu1 %v801_v31 }
 0x3ab   :  { %1390 = vmatpush3.bf16.msra.mxu0 %v849_v32  ;;  %1385 = vmatprep.mubr.msk.bf16.mxu1 %vm1653_vm0, %v1652_v0 }
 0x3ac   :  { %987 = vrot.lane.b32.xlu1 %v1751_v33, %s1646_s28  ;;  %1391 = vmatprep.mubr.msk.bf16.mxu0 %vm1653_vm0, %v1652_v0 }
 0x3ad   :  { %1395 = vmatprep.subr.bf16.mxu1 %v1652_v0  ;;  %1401 = vmatprep.subr.bf16.mxu0 %v1652_v0 }
 0x3b4   :  { %1035 = vrot.lane.b32.xlu0 %v1754_v34, %s1646_s28 }
 0x3ea   :  { %v642_v35 = vpop.xlane.xlu0 %641 }
 0x3eb   :  { %1499 = vrcp.f32 %v642_v35  ;;  %v645_v36 = vpop.xlane.xlu1 %644 }
 0x3ec   :  { %1501 = vrcp.f32 %v645_v36 }
 0x3ef   :  { %v892_v44 = vpop.permute.xlu1 %891 }
 0x3f0   :  { %v897_v20 = vsel %vm703_vm3, %v892_v44, 0 }
 0x3f2   :  { %v648_v37 = vpop.xlane.xlu0 %647 }
 0x3f3   :  { %1503 = vrcp.f32 %v648_v37 }
 0x3f6   :  { %v940_v34 = vpop.permute.xlu0 %939 }
 0x3f7   :  { %v945_v49 = vsel %vm703_vm3, %v940_v34, 0 }
 0x3f8   :  { %v1500_v38 = vpop.eup %1499 }
 0x3f9   :  { %v1502_v39 = vpop.eup %1501  ;;  %v668_v33 = vmul.f32 %v1500_v38, %v1825_v53 }
 0x3fa   :  { %v669_v40 = vmul.f32 %v1502_v39, %v1827_v54  ;;  %v1477_v39 = vld [vmem:[#allocation8 + $0x8] sm:$0xff]  }
 0x3fb   :  { %v676_v41 = vmul.f32 0.5, %v668_v33  ;;  %v1478_v33 = vld [vmem:[#allocation8] sm:$0xff]  }
 0x3fc   :  { %v677_v42 = vmul.f32 0.5, %v669_v40 }
 0x3fd   :  { %v684_v43 = vadd.f32 %v676_v41, %v1854_v19 }
 0x3fe   :  { %v685_v45 = vadd.f32 %v677_v42, %v1854_v19 }
 0x3ff   :  { %v692_v21 = vpack.c.bf16 %v684_v43, %v684_v43 }
 0x400   :  { %v1504_v46 = vpop.eup %1503  ;;  %v693_v47 = vpack.c.bf16 %v685_v45, %v685_v45 }
 0x401   :  { %v670_v48 = vmul.f32 %v1504_v46, %v1833_v57  ;;  %1386 = vmatmul.mubr.msk.bf16.vlgmr.msra.gmra.mxu1 %vm196_vm2, %v692_v21 }
 0x402   :  { %1392 = vmatmul.mubr.msk.bf16.vlgmr.msra.gmra.mxu0 %vm196_vm2, %v693_v47  ;;  %1396 = vmatpush3.bf16.msra.mxu1 %v897_v20 }
 0x403   :  { %1402 = vmatpush3.bf16.msra.mxu0 %v945_v49  ;;  %1397 = vmatprep.mubr.msk.bf16.mxu1 %vm1653_vm0, %v1652_v0  ;;  %v678_v50 = vmul.f32 0.5, %v670_v48 }
 0x404   :  { %1407 = vmatprep.subr.bf16.mxu1 %v1652_v0  ;;  %1403 = vmatprep.mubr.msk.bf16.mxu0 %vm1653_vm0, %v1652_v0 }
 0x405   :  { %v686_v51 = vadd.f32 %v678_v50, %v1854_v19  ;;  %1413 = vmatprep.subr.bf16.mxu0 %v1652_v0 }
 0x407   :  { %v694_v52 = vpack.c.bf16 %v686_v51, %v686_v51 }
 0x409   :  { %1398 = vmatmul.mubr.msk.bf16.vlgmr.msra.gmra.mxu1 %vm196_vm2, %v694_v52 }
 0x40a   :  { %1409 = vmatprep.mubr.msk.bf16.mxu1 %vm1653_vm0, %v1652_v0 }
 0x420   :  { %v651_v53 = vpop.xlane.xlu1 %650 }
 0x421   :  { %1505 = vrcp.f32 %v651_v53 }
 0x424   :  { %v657_v54 = vpop.xlane.xlu1 %656 }
 0x425   :  { %1507 = vrcp.f32 %v657_v54 }
 0x427   :  { %v654_v55 = vpop.xlane.xlu0 %653 }
 0x428   :  { %1509 = vrcp.f32 %v654_v55  ;;  %v988_v56 = vpop.permute.xlu1 %987 }
 0x429   :  { %v993_v57 = vsel %vm703_vm3, %v988_v56, 0 }
 0x42a   :  { %1408 = vmatpush3.bf16.msra.mxu1 %v993_v57 }
 0x42b   :  { %1419 = vmatprep.subr.bf16.mxu1 %v1652_v0  ;;  %v1036_v1 = vpop.permute.xlu0 %1035 }
 0x42c   :  { %v1041_v8 = vsel %vm703_vm3, %v1036_v1, 0 }
 0x42e   :  { %v1506_v58 = vpop.eup %1505 }
 0x42f   :  { %v671_v59 = vmul.f32 %v1506_v58, %v1842_v10 }
 0x431   :  { %v679_v60 = vmul.f32 0.5, %v671_v59 }
 0x432   :  { %v1508_v61 = vpop.eup %1507 }
 0x433   :  { %v673_v62 = vmul.f32 %v1508_v61, %v1846_v11  ;;  %v687_v63 = vadd.f32 %v679_v60, %v1854_v19 }
 0x435   :  { %v1510_v2 = vpop.eup %1509  ;;  %v695_v5 = vpack.c.bf16 %v687_v63, %v687_v63  ;;  %v681_v6 = vmul.f32 0.5, %v673_v62 }
 0x436   :  { %v672_v7 = vmul.f32 %v1510_v2, %v1848_v12 }
 0x437   :  { %1404 = vmatmul.mubr.msk.bf16.vlgmr.msra.gmra.mxu0 %vm196_vm2, %v695_v5  ;;  %v689_v29 = vadd.f32 %v681_v6, %v1854_v19  ;;  %v1270_v5 = vld [vmem:[#allocation10 + $0x1] ss:$0 sm:$0xff] }
 0x438   :  { %1414 = vmatpush3.bf16.msra.mxu0 %v1041_v8  ;;  %1415 = vmatprep.mubr.msk.bf16.mxu0 %vm1653_vm0, %v1652_v0  ;;  %v680_v9 = vmul.f32 0.5, %v672_v7 }
 0x439   :  { %v697_v11 = vpack.c.bf16 %v689_v29, %v689_v29 }
 0x43a   :  { %v688_v10 = vadd.f32 %v680_v9, %v1854_v19 }
 0x43c   :  { %v696_v28 = vpack.c.bf16 %v688_v10, %v688_v10 }
 0x43e   :  { %1410 = vmatmul.mubr.msk.bf16.vlgmr.msra.gmra.mxu1 %vm196_vm2, %v696_v28 }
 0x43f   :  { %1416 = vmatmul.mubr.msk.bf16.vlgmr.msra.gmra.mxu0 %vm196_vm2, %v697_v11  ;;  %1423 = vmatprep.mubr.msk.bf16.mxu1 %vm1653_vm0, %v1652_v0 }
 0x440   :  { %1420 = vmatpush3.bf16.msra.mxu1 %v1477_v39 }
 0x441   :  { %1421 = vmatprep.subr.bf16.mxu1 %v1652_v0 }
 0x444   :  { %1422 = vmatpush3.bf16.msra.mxu1 %v1478_v33  ;;  %v1276_v33 = vld [vmem:[#allocation10 + $0x4] ss:$0 sm:$0xff] }
 0x469   :  { %v741_v12 = vpop.f32.mrf.mxu1 }
 0x46a   :  { %v789_v13 = vpop.f32.mrf.mxu0 }
 0x46b   :  { %v1375_v14 = vpop.f32.mrf.mxu1 }
 0x46c   :  { %v1381_v15 = vpop.f32.mrf.mxu0 }
 0x46d   :  { %v744_v16 = vpop.f32.mrf.mxu1 }
 0x46e   :  { %v792_v17 = vpop.f32.mrf.mxu0 }
 0x46f   :  { %v1376_v18 = vpop.f32.mrf.mxu1 }
 0x470   :  { %v1382_v22 = vpop.f32.mrf.mxu0 }
 0x4c1   :  { %v837_v23 = vpop.f32.mrf.mxu1 }
 0x4c2   :  { %v885_v24 = vpop.f32.mrf.mxu0 }
 0x4c3   :  { %v1460_v19 = vpack.i.bf16 %v885_v24, %v837_v23  ;;  %v1387_v25 = vpop.f32.mrf.mxu1 }
 0x4c4   :  { %v1393_v26 = vpop.f32.mrf.mxu0 }
 0x4c5   :  { %1461 = vrot.lane.b32.xlu1 %v1460_v19, %s1649_s8  ;;  %v840_v27 = vpop.f32.mrf.mxu1 }
 0x4c6   :  { %v888_v30 = vpop.f32.mrf.mxu0 }
 0x4c7   :  { %v1388_v31 = vpop.f32.mrf.mxu1 }
 0x4c8   :  { %v1394_v32 = vpop.f32.mrf.mxu0 }
 0x4c9   :  { %v933_v35 = vpop.f32.mrf.mxu1 }
 0x4cb   :  { %v1399_v36 = vpop.f32.mrf.mxu1 }
 0x4cd   :  { %v936_v37 = vpop.f32.mrf.mxu1 }
 0x4ce   :  { %v1275_v37 = vld [vmem:[#allocation10 + $0x3] ss:$0 sm:$0xff] }
 0x4cf   :  { %v1400_v38 = vpop.f32.mrf.mxu1 }
 0x4f7   :  { %v981_v40 = vpop.f32.mrf.mxu0 }
 0x4f8   :  { %v1465_v41 = vpack.i.bf16 %v981_v40, %v933_v35  ;;  %v1274_v35 = vld [vmem:[#allocation10 + $0x2] ss:$0 sm:$0xff] }
 0x4f9   :  { %v1405_v42 = vpop.f32.mrf.mxu0 }
 0x4fa   :  { %1466 = vrot.lane.b32.xlu0 %v1465_v41, %s1658_s21 }
 0x4fb   :  { %v984_v43 = vpop.f32.mrf.mxu0 }
 0x4fd   :  { %v1406_v44 = vpop.f32.mrf.mxu0 }
 0x4fe   :  { %v1029_v45 = vpop.f32.mrf.mxu1 }
 0x4ff   :  { %v1077_v34 = vpop.f32.mrf.mxu0 }
 0x500   :  { %v1470_v21 = vpack.i.bf16 %v1077_v34, %v1029_v45  ;;  %v1411_v46 = vpop.f32.mrf.mxu1 }
 0x501   :  { %v1417_v47 = vpop.f32.mrf.mxu0 }
 0x502   :  { %1471 = vrot.lane.b32.xlu1 %v1470_v21, %s1659_s22  ;;  %v1032_v20 = vpop.f32.mrf.mxu1 }
 0x503   :  { %v1080_v48 = vpop.f32.mrf.mxu0 }
 0x504   :  { %v1412_v49 = vpop.f32.mrf.mxu1 }
 0x505   :  { %v1418_v0 = vpop.f32.mrf.mxu0 }
 0x537   :  { %v1462_v50 = vpop.permute.xlu1 %1461 }
 0x538   :  { %v1464_v52 = vunpack.i.h.bf16 %v1462_v50  ;;  %v1463_v53 = vunpack.i.l.bf16 %v1462_v50 }
 0x53a   :  { %v1108_v57 = vsel %vm196_vm2, %v789_v13, %v1464_v52  ;;  %v1107_v58 = vsel %vm196_vm2, %v741_v12, %v1463_v53 }
 0x56c   :  { %v1467_v51 = vpop.permute.xlu0 %1466 }
 0x56d   :  { %v1469_v54 = vunpack.i.h.bf16 %v1467_v51  ;;  %v1468_v55 = vunpack.i.l.bf16 %v1467_v51 }
 0x56f   :  { %v1111_v61 = vsel %vm1109_vm4, %v1108_v57, %v1469_v54  ;;  %v1110_v62 = vsel %vm1109_vm4, %v1107_v58, %v1468_v55 }
 0x574   :  { %v1472_v56 = vpop.permute.xlu1 %1471 }
 0x575   :  { %v1474_v59 = vunpack.i.h.bf16 %v1472_v56  ;;  %v1473_v60 = vunpack.i.l.bf16 %v1472_v56 }
 0x577   :  { %v1114_v63 = vsel %vm1112_vm5, %v1111_v61, %v1474_v59  ;;  %v1113_v1 = vsel %vm1112_vm5, %v1110_v62, %v1473_v60 }
 0x578   :  { %v1115_v2 = vpack.c.bf16 %v1114_v63, %v1113_v1 }
 0x57a   :  { %1424 = vmatmul.mubr.msk.bf16.vlgmr.msra.gmra.mxu1 %vm120_vm1, %v1115_v2 }
 0x63a   :  { %v1169_v6 = vpop.f32.mrf.mxu1 }
 0x63b   :  { %v1170_v7 = vadd.f32 %v1270_v5, %v1169_v6 }
 0x63c   :  { %v1425_v8 = vpop.f32.mrf.mxu1 }
 0x63d   :  { %v1176_v9 = vadd.f32 %v1170_v7, %v1719_v3 }
 0x63e   :  { %v1172_v29 = vpop.f32.mrf.mxu1 }
 0x63f   :  { %v1173_v10 = vadd.f32 %v1270_v5, %v1172_v29  ;;  %v1178_v28 = vsel %vm120_vm1, %v1176_v9, 0.0 }
 0x640   :  { %1179 = vadd.xlane.f32.xlu0 %v1178_v28  ;;  %v1426_v11 = vpop.f32.mrf.mxu1 }
 0x641   :  { %v1177_v12 = vadd.f32 %v1173_v10, %v1721_v4 }
 0x643   :  { %v1181_v13 = vsel %vm120_vm1, %v1177_v12, 0.0 }
 0x644   :  { %1182 = vadd.xlane.f32.xlu1 %v1181_v13 }
 0x6c9   :  { %v1180_v14 = vpop.xlane.xlu0 %1179 }
 0x6ca   :  { %v1185_v15 = vmul.f32 0.03125, %v1180_v14 }
 0x6cc   :  { %v1187_v16 = vsub.f32 %v1176_v9, %v1185_v15 }
 0x6cd   :  { %v1183_v17 = vpop.xlane.xlu1 %1182 }
 0x6ce   :  { %v1186_v18 = vmul.f32 0.03125, %v1183_v17  ;;  %v1189_v22 = vmul.f32 %v1187_v16, %v1187_v16 }
 0x6d0   :  { %v1188_v23 = vsub.f32 %v1177_v12, %v1186_v18  ;;  %v1191_v3 = vsel %vm120_vm1, %v1189_v22, 0.0 }
 0x6d1   :  { %1192 = vadd.xlane.f32.xlu0 %v1191_v3 }
 0x6d2   :  { %v1190_v24 = vmul.f32 %v1188_v23, %v1188_v23 }
 0x6d4   :  { %v1194_v19 = vsel %vm120_vm1, %v1190_v24, 0.0 }
 0x6d5   :  { %1195 = vadd.xlane.f32.xlu0 %v1194_v19 }
 0x75a   :  { %v1193_v25 = vpop.xlane.xlu0 %1192 }
 0x75b   :  { %v1197_v26 = vmul.f32 0.03125, %v1193_v25 }
 0x75d   :  { %v1199_v4 = vadd.f32 1e-05, %v1197_v26 }
 0x75e   :  { %v1196_v27 = vpop.xlane.xlu0 %1195 }
 0x75f   :  { %1511 = vrsqrt.f32 %v1199_v4  ;;  %v1198_v30 = vmul.f32 0.03125, %v1196_v27 }
 0x761   :  { %v1200_v31 = vadd.f32 1e-05, %v1198_v30 }
 0x763   :  { %1513 = vrsqrt.f32 %v1200_v31 }
 0x76c   :  { %v1512_v32 = vpop.eup %1511 }
 0x76d   :  { %v1203_v36 = vmul.f32 %v1512_v32, %v1187_v16 }
 0x76f   :  { %v1209_v38 = vmul.f32 %v1274_v35, %v1203_v36 }
 0x770   :  { %v1514_v39 = vpop.eup %1513 }
 0x771   :  { %v1204_v40 = vmul.f32 %v1514_v39, %v1188_v23  ;;  %v1215_v41 = vadd.f32 %v1275_v37, %v1209_v38 }
 0x773   :  { %v1210_v42 = vmul.f32 %v1274_v35, %v1204_v40  ;;  %vm1217_vm6 = vcmp.gt.f32.partialorder %v1215_v41, 0.0  ;;  %v1223_v43 = vmul.f32 %v1276_v33, %v1215_v41 }
 0x775   :  { %v1216_v44 = vadd.f32 %v1275_v37, %v1210_v42  ;;  %v1225_v45 = vsel %vm1217_vm6, %v1215_v41, %v1223_v43 }
 0x776   :  { %v1227_v34 = vsel %vm120_vm1, %v1225_v45, 0.0 }
 0x777   :  { %vm1218_vm7 = vcmp.gt.f32.partialorder %v1216_v44, 0.0  ;;  %v1224_v21 = vmul.f32 %v1276_v33, %v1216_v44  ;;  %1229 = vst [vmem:[#allocation11] sm:$0xff] %v1227_v34 }
 0x779   :  { %v1226_v46 = vsel %vm1218_vm7, %v1216_v44, %v1224_v21 }
 0x77a   :  { %v1228_v47 = vsel %vm120_vm1, %v1226_v46, 0.0 }
 0x77b   :  { %1230 = vst [vmem:[#allocation11 + $0x8] sm:$0xff] %v1228_v47 }
 0x77c   :  { %1626 = shalt.err (!%p1623_p1)
}
 0x77d   :  { %1242 = dma.vmem_to_hbm [thread:$0]  %s1237_s24, 256, %s1931_s5, [#allocation4], %s1648_s7, %s1648_s7, %s1649_s8  }
 0x77e   :  { %1641 = dma.done.wait [#allocation4], 256  }
 0x77f   :  { %1642 = vsyncadd [#allocation4], 4294967040 }
 0x780   :  { %1246 = vsyncpa [#allocation3], 1 }
 0x781   :  { %1247 = vsyncpa [#allocation6], 1 }
 0x782   :  { %1248 = vsyncpa [#allocation9], 1 }
 0x783   :  { %1249 = vsyncpa [#allocation4], 1 }

</bundles_post_ra>
